<compile_context>
chip_gen: v7x
topology: tpu7x:2x2x1
jax: 0.10.0
libtpu: 0.0.40
codegen_flags: <defaults>
</compile_context>

<pallas_src>
import jax
import jax.numpy as jnp
from jax.experimental import pallas as pl
from jax.experimental.pallas import tpu as pltpu


def basic_lm_kernel(xp_ref, whh_ref, wout_ref, bout_ref, out_ref, hs_ref):
    T = xp_ref.shape[0]          # sequence length (static)
    H = whh_ref.shape[0]         # hidden dim

    # --- hoist loop-invariant recurrent weight (4 vreg tiles) ---
    whh = whh_ref[...]                                                   # (H, 4H)

    # Lane mask selecting the g-gate lanes [2H, 3H) of the fused 4H gate axis.
    lane = jax.lax.broadcasted_iota(jnp.int32, (1, 4 * H), 1)
    g_mask = jnp.logical_and(lane >= 2 * H, lane < 3 * H)

    # --- sequential LSTM recurrence, fully unrolled, state in vregs ---
    h = jnp.zeros((1, H), jnp.float32)
    c = jnp.zeros((1, H), jnp.float32)
    for t in range(T):                                                   # static unroll
        gates = xp_ref[pl.ds(t, 1), :] + jnp.dot(
            h, whh, preferred_element_type=jnp.float32)                  # (1, 4H)
        sig = jax.nn.sigmoid(gates)          # one EUP push over full (1,4H) vreg
        th = jnp.tanh(gates)                 # one EUP push over full (1,4H) vreg
        acts = jnp.where(g_mask, th, sig)    # i,f,o <- sigmoid lanes; g <- tanh lanes
        i_g = acts[:, 0:H]
        f_g = acts[:, H:2 * H]
        g_g = acts[:, 2 * H:3 * H]
        o_g = acts[:, 3 * H:4 * H]
        c = f_g * c + i_g * g_g
        h = o_g * jnp.tanh(c)
        hs_ref[pl.ds(t, 1), :] = h           # static-row store into VMEM scratch

    # --- hidden2vocab + log_softmax over vocab axis ---
    hs = hs_ref[...]                                                     # (T, H)
    logits = jnp.dot(hs, wout_ref[...],
                     preferred_element_type=jnp.float32) + bout_ref[...]  # (T, V)
    m = jnp.max(logits, axis=1, keepdims=True)
    z = logits - m
    lse = jnp.log(jnp.sum(jnp.exp(z), axis=1, keepdims=True))
    out_ref[...] = z - lse


def prepare_params(emb, w_ih, w_hh, b_ih, b_hh, w_out, b_out):
    """One-time weight preprocessing (hoisted out of the per-call path)."""
    H = w_hh.shape[1]
    V = w_out.shape[0]
    # Fused embedding + input projection table: (V, 4H)
    xp_table = (emb.astype(jnp.float32) @ w_ih.T.astype(jnp.float32)
                + (b_ih + b_hh).astype(jnp.float32).reshape(1, 4 * H))
    whh_t = w_hh.T.astype(jnp.float32)                          # (H, 4H)
    wout_t = w_out.T.astype(jnp.float32)                        # (H, V)
    bout = b_out.reshape(1, V).astype(jnp.float32)              # (1, V)
    return (jnp.asarray(xp_table), jnp.asarray(whh_t),
            jnp.asarray(wout_t), jnp.asarray(bout))


@jax.jit
def basic_lm_forward(document, params):
    """document: (T,) int32 token ids. Returns (T, V) log-probs (float32)."""
    xp_table, whh_t, wout_t, bout = params
    T = document.shape[0]
    H = whh_t.shape[0]
    V = wout_t.shape[1]

    # Per-call work: a trivial (T, 4H) row gather, then the kernel.
    xp = xp_table[document]                                     # (T, 4H)

    return pl.pallas_call(
        basic_lm_kernel,
        out_shape=jax.ShapeDtypeStruct((T, V), jnp.float32),
        in_specs=[pl.BlockSpec(memory_space=pltpu.MemorySpace.VMEM)] * 4,
        out_specs=pl.BlockSpec(memory_space=pltpu.MemorySpace.VMEM),
        scratch_shapes=[pltpu.VMEM((T, H), jnp.float32)],
    )(xp, whh_t, wout_t, bout)


def reference_forward(document, emb, w_ih, w_hh, b_ih, b_hh, w_out, b_out):
    """Pure-JAX reference matching torch.nn.LSTM semantics (batch=1)."""
    H = w_hh.shape[1]
    x = emb[document]                                   # (T, E)
    h = jnp.zeros((H,), jnp.float32)
    c = jnp.zeros((H,), jnp.float32)
    outs = []
    for t in range(x.shape[0]):
        gates = w_ih @ x[t] + b_ih + w_hh @ h + b_hh
        i = jax.nn.sigmoid(gates[0:H])
        f = jax.nn.sigmoid(gates[H:2 * H])
        g = jnp.tanh(gates[2 * H:3 * H])
        o = jax.nn.sigmoid(gates[3 * H:4 * H])
        c = f * c + i * g
        h = o * jnp.tanh(c)
        outs.append(h)
    hs = jnp.stack(outs)                                # (T, H)
    logits = hs @ w_out.T + b_out
    return jax.nn.log_softmax(logits, axis=1)


if __name__ == "__main__":
    # Small shapes implied by the module: seq=8, embedding_dim=16, hidden=32, vocab=64
    E, H, V, T = 16, 32, 64, 8

    key = jax.random.PRNGKey(0)
    ks = jax.random.split(key, 8)
    stdv = 1.0 / float(H) ** 0.5

    emb = jax.random.normal(ks[0], (V, E), jnp.float32)                       # nn.Embedding
    w_ih = jax.random.uniform(ks[1], (4 * H, E), jnp.float32, -stdv, stdv)    # lstm.weight_ih_l0
    w_hh = jax.random.uniform(ks[2], (4 * H, H), jnp.float32, -stdv, stdv)    # lstm.weight_hh_l0
    b_ih = jax.random.uniform(ks[3], (4 * H,), jnp.float32, -stdv, stdv)      # lstm.bias_ih_l0
    b_hh = jax.random.uniform(ks[4], (4 * H,), jnp.float32, -stdv, stdv)      # lstm.bias_hh_l0
    w_out = jax.random.uniform(ks[5], (V, H), jnp.float32, -stdv, stdv)       # hidden2vocab.weight
    b_out = jax.random.uniform(ks[6], (V,), jnp.float32, -stdv, stdv)         # hidden2vocab.bias
    document = jax.random.randint(ks[7], (T,), 0, V, jnp.int32)

    # One-time parameter preparation (cached across calls).
    params = prepare_params(emb, w_ih, w_hh, b_ih, b_hh, w_out, b_out)

    scores = basic_lm_forward(document, params)
    scores = jax.block_until_ready(scores)

    ref = reference_forward(document, emb, w_ih, w_hh, b_ih, b_hh, w_out, b_out)
    assert scores.shape == (T, V)
    assert jnp.allclose(scores, ref, atol=1e-4, rtol=1e-4), "mismatch vs reference"

    print("KERNEL_OK")
</pallas_src>

<mosaic_0001>
module attributes {stable_mosaic.version = 11 : i64} {
  func.func @basic_lm_kernel(%arg0: memref<8x128xf32, #tpu.memory_space<vmem>>, %arg1: memref<32x128xf32, #tpu.memory_space<vmem>>, %arg2: memref<32x64xf32, #tpu.memory_space<vmem>>, %arg3: memref<1x64xf32, #tpu.memory_space<vmem>>, %arg4: memref<8x64xf32, #tpu.memory_space<vmem>>, %arg5: memref<8x32xf32, #tpu.memory_space<vmem>>) attributes {dimension_semantics = [], scalar_prefetch = 0 : i64, scratch_operands = 1 : i64, tpu.core_type = #tpu.core_type<tc>} {
    %c0 = arith.constant 0 : index
    %c0_0 = arith.constant 0 : index
    %0 = vector.load %arg1[%c0, %c0_0] : memref<32x128xf32, #tpu.memory_space<vmem>>, vector<32x128xf32>
    %1 = tpu.iota {dimensions = array<i32: 1>} : vector<1x128xi32>
    %c64_i32 = arith.constant 64 : i32
    %2 = vector.broadcast %c64_i32 : i32 to vector<1x128xi32>
    %3 = arith.cmpi sge, %1, %2 : vector<1x128xi32>
    %c96_i32 = arith.constant 96 : i32
    %4 = vector.broadcast %c96_i32 : i32 to vector<1x128xi32>
    %5 = arith.cmpi slt, %1, %4 : vector<1x128xi32>
    %6 = arith.andi %3, %5 : vector<1x128xi1>
    %cst = arith.constant 0.000000e+00 : f32
    %7 = vector.broadcast %cst : f32 to vector<1x32xf32>
    %cst_1 = arith.constant 0.000000e+00 : f32
    %8 = vector.broadcast %cst_1 : f32 to vector<1x32xf32>
    %c0_2 = arith.constant 0 : index
    %c0_3 = arith.constant 0 : index
    %9 = vector.load %arg0[%c0_2, %c0_3] : memref<8x128xf32, #tpu.memory_space<vmem>>, vector<1x128xf32>
    %cst_4 = arith.constant dense<0.000000e+00> : vector<1x128xf32>
    %10 = tpu.matmul %7, %0, %cst_4 {dimension_numbers = #tpu.dot_dimension_numbers<[1], [0], [0], [1], [0, 0, 1, 1], [], []>} : vector<1x32xf32>, vector<32x128xf32>, vector<1x128xf32> -> vector<1x128xf32>
    %11 = arith.addf %9, %10 : vector<1x128xf32>
    %12 = arith.negf %11 : vector<1x128xf32>
    %13 = math.exp %12 : vector<1x128xf32>
    %cst_5 = arith.constant 1.000000e+00 : f32
    %14 = vector.broadcast %cst_5 : f32 to vector<1x128xf32>
    %15 = arith.addf %14, %13 : vector<1x128xf32>
    %16 = arith.divf %14, %15 : vector<1x128xf32>
    %17 = math.tanh %11 : vector<1x128xf32>
    %18 = arith.select %6, %17, %16 : vector<1x128xi1>, vector<1x128xf32>
    %19 = vector.extract_strided_slice %18 {offsets = [0, 0], sizes = [1, 32], strides = [1, 1]} : vector<1x128xf32> to vector<1x32xf32>
    %20 = vector.extract_strided_slice %18 {offsets = [0, 32], sizes = [1, 32], strides = [1, 1]} : vector<1x128xf32> to vector<1x32xf32>
    %21 = vector.extract_strided_slice %18 {offsets = [0, 64], sizes = [1, 32], strides = [1, 1]} : vector<1x128xf32> to vector<1x32xf32>
    %22 = vector.extract_strided_slice %18 {offsets = [0, 96], sizes = [1, 32], strides = [1, 1]} : vector<1x128xf32> to vector<1x32xf32>
    %23 = arith.mulf %20, %8 : vector<1x32xf32>
    %24 = arith.mulf %19, %21 : vector<1x32xf32>
    %25 = arith.addf %23, %24 : vector<1x32xf32>
    %26 = math.tanh %25 : vector<1x32xf32>
    %27 = arith.mulf %22, %26 : vector<1x32xf32>
    %c0_6 = arith.constant 0 : index
    %c0_7 = arith.constant 0 : index
    %28 = vector.load %arg5[%c0_6, %c0_7] : memref<8x32xf32, #tpu.memory_space<vmem>>, vector<1x32xf32>
    tpu.vector_store %arg5[%c0_6, %c0_7], %27 {strides = array<i32>} : memref<8x32xf32, #tpu.memory_space<vmem>>, vector<1x32xf32>,
    %c1 = arith.constant 1 : index
    %c0_8 = arith.constant 0 : index
    %29 = vector.load %arg0[%c1, %c0_8] : memref<8x128xf32, #tpu.memory_space<vmem>>, vector<1x128xf32>
    %cst_9 = arith.constant dense<0.000000e+00> : vector<1x128xf32>
    %30 = tpu.matmul %27, %0, %cst_9 {dimension_numbers = #tpu.dot_dimension_numbers<[1], [0], [0], [1], [0, 0, 1, 1], [], []>} : vector<1x32xf32>, vector<32x128xf32>, vector<1x128xf32> -> vector<1x128xf32>
    %31 = arith.addf %29, %30 : vector<1x128xf32>
    %32 = arith.negf %31 : vector<1x128xf32>
    %33 = math.exp %32 : vector<1x128xf32>
    %cst_10 = arith.constant 1.000000e+00 : f32
    %34 = vector.broadcast %cst_10 : f32 to vector<1x128xf32>
    %35 = arith.addf %34, %33 : vector<1x128xf32>
    %36 = arith.divf %34, %35 : vector<1x128xf32>
    %37 = math.tanh %31 : vector<1x128xf32>
    %38 = arith.select %6, %37, %36 : vector<1x128xi1>, vector<1x128xf32>
    %39 = vector.extract_strided_slice %38 {offsets = [0, 0], sizes = [1, 32], strides = [1, 1]} : vector<1x128xf32> to vector<1x32xf32>
    %40 = vector.extract_strided_slice %38 {offsets = [0, 32], sizes = [1, 32], strides = [1, 1]} : vector<1x128xf32> to vector<1x32xf32>
    %41 = vector.extract_strided_slice %38 {offsets = [0, 64], sizes = [1, 32], strides = [1, 1]} : vector<1x128xf32> to vector<1x32xf32>
    %42 = vector.extract_strided_slice %38 {offsets = [0, 96], sizes = [1, 32], strides = [1, 1]} : vector<1x128xf32> to vector<1x32xf32>
    %43 = arith.mulf %40, %25 : vector<1x32xf32>
    %44 = arith.mulf %39, %41 : vector<1x32xf32>
    %45 = arith.addf %43, %44 : vector<1x32xf32>
    %46 = math.tanh %45 : vector<1x32xf32>
    %47 = arith.mulf %42, %46 : vector<1x32xf32>
    %c1_11 = arith.constant 1 : index
    %c0_12 = arith.constant 0 : index
    %48 = vector.load %arg5[%c1_11, %c0_12] : memref<8x32xf32, #tpu.memory_space<vmem>>, vector<1x32xf32>
    tpu.vector_store %arg5[%c1_11, %c0_12], %47 {strides = array<i32>} : memref<8x32xf32, #tpu.memory_space<vmem>>, vector<1x32xf32>,
    %c2 = arith.constant 2 : index
    %c0_13 = arith.constant 0 : index
    %49 = vector.load %arg0[%c2, %c0_13] : memref<8x128xf32, #tpu.memory_space<vmem>>, vector<1x128xf32>
    %cst_14 = arith.constant dense<0.000000e+00> : vector<1x128xf32>
    %50 = tpu.matmul %47, %0, %cst_14 {dimension_numbers = #tpu.dot_dimension_numbers<[1], [0], [0], [1], [0, 0, 1, 1], [], []>} : vector<1x32xf32>, vector<32x128xf32>, vector<1x128xf32> -> vector<1x128xf32>
    %51 = arith.addf %49, %50 : vector<1x128xf32>
    %52 = arith.negf %51 : vector<1x128xf32>
    %53 = math.exp %52 : vector<1x128xf32>
    %cst_15 = arith.constant 1.000000e+00 : f32
    %54 = vector.broadcast %cst_15 : f32 to vector<1x128xf32>
    %55 = arith.addf %54, %53 : vector<1x128xf32>
    %56 = arith.divf %54, %55 : vector<1x128xf32>
    %57 = math.tanh %51 : vector<1x128xf32>
    %58 = arith.select %6, %57, %56 : vector<1x128xi1>, vector<1x128xf32>
    %59 = vector.extract_strided_slice %58 {offsets = [0, 0], sizes = [1, 32], strides = [1, 1]} : vector<1x128xf32> to vector<1x32xf32>
    %60 = vector.extract_strided_slice %58 {offsets = [0, 32], sizes = [1, 32], strides = [1, 1]} : vector<1x128xf32> to vector<1x32xf32>
    %61 = vector.extract_strided_slice %58 {offsets = [0, 64], sizes = [1, 32], strides = [1, 1]} : vector<1x128xf32> to vector<1x32xf32>
    %62 = vector.extract_strided_slice %58 {offsets = [0, 96], sizes = [1, 32], strides = [1, 1]} : vector<1x128xf32> to vector<1x32xf32>
    %63 = arith.mulf %60, %45 : vector<1x32xf32>
    %64 = arith.mulf %59, %61 : vector<1x32xf32>
    %65 = arith.addf %63, %64 : vector<1x32xf32>
    %66 = math.tanh %65 : vector<1x32xf32>
    %67 = arith.mulf %62, %66 : vector<1x32xf32>
    %c2_16 = arith.constant 2 : index
    %c0_17 = arith.constant 0 : index
    %68 = vector.load %arg5[%c2_16, %c0_17] : memref<8x32xf32, #tpu.memory_space<vmem>>, vector<1x32xf32>
    tpu.vector_store %arg5[%c2_16, %c0_17], %67 {strides = array<i32>} : memref<8x32xf32, #tpu.memory_space<vmem>>, vector<1x32xf32>,
    %c3 = arith.constant 3 : index
    %c0_18 = arith.constant 0 : index
    %69 = vector.load %arg0[%c3, %c0_18] : memref<8x128xf32, #tpu.memory_space<vmem>>, vector<1x128xf32>
    %cst_19 = arith.constant dense<0.000000e+00> : vector<1x128xf32>
    %70 = tpu.matmul %67, %0, %cst_19 {dimension_numbers = #tpu.dot_dimension_numbers<[1], [0], [0], [1], [0, 0, 1, 1], [], []>} : vector<1x32xf32>, vector<32x128xf32>, vector<1x128xf32> -> vector<1x128xf32>
    %71 = arith.addf %69, %70 : vector<1x128xf32>
    %72 = arith.negf %71 : vector<1x128xf32>
    %73 = math.exp %72 : vector<1x128xf32>
    %cst_20 = arith.constant 1.000000e+00 : f32
    %74 = vector.broadcast %cst_20 : f32 to vector<1x128xf32>
    %75 = arith.addf %74, %73 : vector<1x128xf32>
    %76 = arith.divf %74, %75 : vector<1x128xf32>
    %77 = math.tanh %71 : vector<1x128xf32>
    %78 = arith.select %6, %77, %76 : vector<1x128xi1>, vector<1x128xf32>
    %79 = vector.extract_strided_slice %78 {offsets = [0, 0], sizes = [1, 32], strides = [1, 1]} : vector<1x128xf32> to vector<1x32xf32>
    %80 = vector.extract_strided_slice %78 {offsets = [0, 32], sizes = [1, 32], strides = [1, 1]} : vector<1x128xf32> to vector<1x32xf32>
    %81 = vector.extract_strided_slice %78 {offsets = [0, 64], sizes = [1, 32], strides = [1, 1]} : vector<1x128xf32> to vector<1x32xf32>
    %82 = vector.extract_strided_slice %78 {offsets = [0, 96], sizes = [1, 32], strides = [1, 1]} : vector<1x128xf32> to vector<1x32xf32>
    %83 = arith.mulf %80, %65 : vector<1x32xf32>
    %84 = arith.mulf %79, %81 : vector<1x32xf32>
    %85 = arith.addf %83, %84 : vector<1x32xf32>
    %86 = math.tanh %85 : vector<1x32xf32>
    %87 = arith.mulf %82, %86 : vector<1x32xf32>
    %c3_21 = arith.constant 3 : index
    %c0_22 = arith.constant 0 : index
    %88 = vector.load %arg5[%c3_21, %c0_22] : memref<8x32xf32, #tpu.memory_space<vmem>>, vector<1x32xf32>
    tpu.vector_store %arg5[%c3_21, %c0_22], %87 {strides = array<i32>} : memref<8x32xf32, #tpu.memory_space<vmem>>, vector<1x32xf32>,
    %c4 = arith.constant 4 : index
    %c0_23 = arith.constant 0 : index
    %89 = vector.load %arg0[%c4, %c0_23] : memref<8x128xf32, #tpu.memory_space<vmem>>, vector<1x128xf32>
    %cst_24 = arith.constant dense<0.000000e+00> : vector<1x128xf32>
    %90 = tpu.matmul %87, %0, %cst_24 {dimension_numbers = #tpu.dot_dimension_numbers<[1], [0], [0], [1], [0, 0, 1, 1], [], []>} : vector<1x32xf32>, vector<32x128xf32>, vector<1x128xf32> -> vector<1x128xf32>
    %91 = arith.addf %89, %90 : vector<1x128xf32>
    %92 = arith.negf %91 : vector<1x128xf32>
    %93 = math.exp %92 : vector<1x128xf32>
    %cst_25 = arith.constant 1.000000e+00 : f32
    %94 = vector.broadcast %cst_25 : f32 to vector<1x128xf32>
    %95 = arith.addf %94, %93 : vector<1x128xf32>
    %96 = arith.divf %94, %95 : vector<1x128xf32>
    %97 = math.tanh %91 : vector<1x128xf32>
    %98 = arith.select %6, %97, %96 : vector<1x128xi1>, vector<1x128xf32>
    %99 = vector.extract_strided_slice %98 {offsets = [0, 0], sizes = [1, 32], strides = [1, 1]} : vector<1x128xf32> to vector<1x32xf32>
    %100 = vector.extract_strided_slice %98 {offsets = [0, 32], sizes = [1, 32], strides = [1, 1]} : vector<1x128xf32> to vector<1x32xf32>
    %101 = vector.extract_strided_slice %98 {offsets = [0, 64], sizes = [1, 32], strides = [1, 1]} : vector<1x128xf32> to vector<1x32xf32>
    %102 = vector.extract_strided_slice %98 {offsets = [0, 96], sizes = [1, 32], strides = [1, 1]} : vector<1x128xf32> to vector<1x32xf32>
    %103 = arith.mulf %100, %85 : vector<1x32xf32>
    %104 = arith.mulf %99, %101 : vector<1x32xf32>
    %105 = arith.addf %103, %104 : vector<1x32xf32>
    %106 = math.tanh %105 : vector<1x32xf32>
    %107 = arith.mulf %102, %106 : vector<1x32xf32>
    %c4_26 = arith.constant 4 : index
    %c0_27 = arith.constant 0 : index
    %108 = vector.load %arg5[%c4_26, %c0_27] : memref<8x32xf32, #tpu.memory_space<vmem>>, vector<1x32xf32>
    tpu.vector_store %arg5[%c4_26, %c0_27], %107 {strides = array<i32>} : memref<8x32xf32, #tpu.memory_space<vmem>>, vector<1x32xf32>,
    %c5 = arith.constant 5 : index
    %c0_28 = arith.constant 0 : index
    %109 = vector.load %arg0[%c5, %c0_28] : memref<8x128xf32, #tpu.memory_space<vmem>>, vector<1x128xf32>
    %cst_29 = arith.constant dense<0.000000e+00> : vector<1x128xf32>
    %110 = tpu.matmul %107, %0, %cst_29 {dimension_numbers = #tpu.dot_dimension_numbers<[1], [0], [0], [1], [0, 0, 1, 1], [], []>} : vector<1x32xf32>, vector<32x128xf32>, vector<1x128xf32> -> vector<1x128xf32>
    %111 = arith.addf %109, %110 : vector<1x128xf32>
    %112 = arith.negf %111 : vector<1x128xf32>
    %113 = math.exp %112 : vector<1x128xf32>
    %cst_30 = arith.constant 1.000000e+00 : f32
    %114 = vector.broadcast %cst_30 : f32 to vector<1x128xf32>
    %115 = arith.addf %114, %113 : vector<1x128xf32>
    %116 = arith.divf %114, %115 : vector<1x128xf32>
    %117 = math.tanh %111 : vector<1x128xf32>
    %118 = arith.select %6, %117, %116 : vector<1x128xi1>, vector<1x128xf32>
    %119 = vector.extract_strided_slice %118 {offsets = [0, 0], sizes = [1, 32], strides = [1, 1]} : vector<1x128xf32> to vector<1x32xf32>
    %120 = vector.extract_strided_slice %118 {offsets = [0, 32], sizes = [1, 32], strides = [1, 1]} : vector<1x128xf32> to vector<1x32xf32>
    %121 = vector.extract_strided_slice %118 {offsets = [0, 64], sizes = [1, 32], strides = [1, 1]} : vector<1x128xf32> to vector<1x32xf32>
    %122 = vector.extract_strided_slice %118 {offsets = [0, 96], sizes = [1, 32], strides = [1, 1]} : vector<1x128xf32> to vector<1x32xf32>
    %123 = arith.mulf %120, %105 : vector<1x32xf32>
    %124 = arith.mulf %119, %121 : vector<1x32xf32>
    %125 = arith.addf %123, %124 : vector<1x32xf32>
    %126 = math.tanh %125 : vector<1x32xf32>
    %127 = arith.mulf %122, %126 : vector<1x32xf32>
    %c5_31 = arith.constant 5 : index
    %c0_32 = arith.constant 0 : index
    %128 = vector.load %arg5[%c5_31, %c0_32] : memref<8x32xf32, #tpu.memory_space<vmem>>, vector<1x32xf32>
    tpu.vector_store %arg5[%c5_31, %c0_32], %127 {strides = array<i32>} : memref<8x32xf32, #tpu.memory_space<vmem>>, vector<1x32xf32>,
    %c6 = arith.constant 6 : index
    %c0_33 = arith.constant 0 : index
    %129 = vector.load %arg0[%c6, %c0_33] : memref<8x128xf32, #tpu.memory_space<vmem>>, vector<1x128xf32>
    %cst_34 = arith.constant dense<0.000000e+00> : vector<1x128xf32>
    %130 = tpu.matmul %127, %0, %cst_34 {dimension_numbers = #tpu.dot_dimension_numbers<[1], [0], [0], [1], [0, 0, 1, 1], [], []>} : vector<1x32xf32>, vector<32x128xf32>, vector<1x128xf32> -> vector<1x128xf32>
    %131 = arith.addf %129, %130 : vector<1x128xf32>
    %132 = arith.negf %131 : vector<1x128xf32>
    %133 = math.exp %132 : vector<1x128xf32>
    %cst_35 = arith.constant 1.000000e+00 : f32
    %134 = vector.broadcast %cst_35 : f32 to vector<1x128xf32>
    %135 = arith.addf %134, %133 : vector<1x128xf32>
    %136 = arith.divf %134, %135 : vector<1x128xf32>
    %137 = math.tanh %131 : vector<1x128xf32>
    %138 = arith.select %6, %137, %136 : vector<1x128xi1>, vector<1x128xf32>
    %139 = vector.extract_strided_slice %138 {offsets = [0, 0], sizes = [1, 32], strides = [1, 1]} : vector<1x128xf32> to vector<1x32xf32>
    %140 = vector.extract_strided_slice %138 {offsets = [0, 32], sizes = [1, 32], strides = [1, 1]} : vector<1x128xf32> to vector<1x32xf32>
    %141 = vector.extract_strided_slice %138 {offsets = [0, 64], sizes = [1, 32], strides = [1, 1]} : vector<1x128xf32> to vector<1x32xf32>
    %142 = vector.extract_strided_slice %138 {offsets = [0, 96], sizes = [1, 32], strides = [1, 1]} : vector<1x128xf32> to vector<1x32xf32>
    %143 = arith.mulf %140, %125 : vector<1x32xf32>
    %144 = arith.mulf %139, %141 : vector<1x32xf32>
    %145 = arith.addf %143, %144 : vector<1x32xf32>
    %146 = math.tanh %145 : vector<1x32xf32>
    %147 = arith.mulf %142, %146 : vector<1x32xf32>
    %c6_36 = arith.constant 6 : index
    %c0_37 = arith.constant 0 : index
    %148 = vector.load %arg5[%c6_36, %c0_37] : memref<8x32xf32, #tpu.memory_space<vmem>>, vector<1x32xf32>
    tpu.vector_store %arg5[%c6_36, %c0_37], %147 {strides = array<i32>} : memref<8x32xf32, #tpu.memory_space<vmem>>, vector<1x32xf32>,
    %c7 = arith.constant 7 : index
    %c0_38 = arith.constant 0 : index
    %149 = vector.load %arg0[%c7, %c0_38] : memref<8x128xf32, #tpu.memory_space<vmem>>, vector<1x128xf32>
    %cst_39 = arith.constant dense<0.000000e+00> : vector<1x128xf32>
    %150 = tpu.matmul %147, %0, %cst_39 {dimension_numbers = #tpu.dot_dimension_numbers<[1], [0], [0], [1], [0, 0, 1, 1], [], []>} : vector<1x32xf32>, vector<32x128xf32>, vector<1x128xf32> -> vector<1x128xf32>
    %151 = arith.addf %149, %150 : vector<1x128xf32>
    %152 = arith.negf %151 : vector<1x128xf32>
    %153 = math.exp %152 : vector<1x128xf32>
    %cst_40 = arith.constant 1.000000e+00 : f32
    %154 = vector.broadcast %cst_40 : f32 to vector<1x128xf32>
    %155 = arith.addf %154, %153 : vector<1x128xf32>
    %156 = arith.divf %154, %155 : vector<1x128xf32>
    %157 = math.tanh %151 : vector<1x128xf32>
    %158 = arith.select %6, %157, %156 : vector<1x128xi1>, vector<1x128xf32>
    %159 = vector.extract_strided_slice %158 {offsets = [0, 0], sizes = [1, 32], strides = [1, 1]} : vector<1x128xf32> to vector<1x32xf32>
    %160 = vector.extract_strided_slice %158 {offsets = [0, 32], sizes = [1, 32], strides = [1, 1]} : vector<1x128xf32> to vector<1x32xf32>
    %161 = vector.extract_strided_slice %158 {offsets = [0, 64], sizes = [1, 32], strides = [1, 1]} : vector<1x128xf32> to vector<1x32xf32>
    %162 = vector.extract_strided_slice %158 {offsets = [0, 96], sizes = [1, 32], strides = [1, 1]} : vector<1x128xf32> to vector<1x32xf32>
    %163 = arith.mulf %160, %145 : vector<1x32xf32>
    %164 = arith.mulf %159, %161 : vector<1x32xf32>
    %165 = arith.addf %163, %164 : vector<1x32xf32>
    %166 = math.tanh %165 : vector<1x32xf32>
    %167 = arith.mulf %162, %166 : vector<1x32xf32>
    %c7_41 = arith.constant 7 : index
    %c0_42 = arith.constant 0 : index
    %168 = vector.load %arg5[%c7_41, %c0_42] : memref<8x32xf32, #tpu.memory_space<vmem>>, vector<1x32xf32>
    tpu.vector_store %arg5[%c7_41, %c0_42], %167 {strides = array<i32>} : memref<8x32xf32, #tpu.memory_space<vmem>>, vector<1x32xf32>,
    %c0_43 = arith.constant 0 : index
    %c0_44 = arith.constant 0 : index
    %169 = vector.load %arg5[%c0_43, %c0_44] : memref<8x32xf32, #tpu.memory_space<vmem>>, vector<8x32xf32>
    %c0_45 = arith.constant 0 : index
    %c0_46 = arith.constant 0 : index
    %170 = vector.load %arg2[%c0_45, %c0_46] : memref<32x64xf32, #tpu.memory_space<vmem>>, vector<32x64xf32>
    %cst_47 = arith.constant dense<0.000000e+00> : vector<8x64xf32>
    %171 = tpu.matmul %169, %170, %cst_47 {dimension_numbers = #tpu.dot_dimension_numbers<[1], [0], [0], [1], [0, 0, 1, 1], [], []>} : vector<8x32xf32>, vector<32x64xf32>, vector<8x64xf32> -> vector<8x64xf32>
    %c0_48 = arith.constant 0 : index
    %c0_49 = arith.constant 0 : index
    %172 = vector.load %arg3[%c0_48, %c0_49] : memref<1x64xf32, #tpu.memory_space<vmem>>, vector<1x64xf32>
    %173 = vector.broadcast %172 : vector<1x64xf32> to vector<8x64xf32>
    %174 = arith.addf %171, %173 : vector<8x64xf32>
    %cst_50 = arith.constant dense<0xFF800000> : vector<8xf32>
    %175 = vector.multi_reduction <maximumf>, %174, %cst_50 [1] : vector<8x64xf32> to vector<8xf32>
    %176 = vector.shape_cast %175 : vector<8xf32> to vector<8x1xf32>
    %177 = vector.broadcast %176 : vector<8x1xf32> to vector<8x64xf32>
    %178 = arith.subf %174, %177 : vector<8x64xf32>
    %179 = math.exp %178 : vector<8x64xf32>
    %cst_51 = arith.constant dense<0.000000e+00> : vector<8xf32>
    %180 = vector.multi_reduction <add>, %179, %cst_51 [1] : vector<8x64xf32> to vector<8xf32>
    %181 = vector.shape_cast %180 : vector<8xf32> to vector<8x1xf32>
    %182 = math.log %181 : vector<8x1xf32>
    %183 = vector.broadcast %182 : vector<8x1xf32> to vector<8x64xf32>
    %184 = arith.subf %178, %183 : vector<8x64xf32>
    %c0_52 = arith.constant 0 : index
    %c0_53 = arith.constant 0 : index
    %185 = vector.load %arg4[%c0_52, %c0_53] : memref<8x64xf32, #tpu.memory_space<vmem>>, vector<8x64xf32>
    tpu.vector_store %arg4[%c0_52, %c0_53], %184 {strides = array<i32>} : memref<8x64xf32, #tpu.memory_space<vmem>>, vector<8x64xf32>,
    return
  }
}

</mosaic_0001>

<bundles_post_ra>
// kernel: basic_lm_forward.1
= control target key start
LH: loop header
LB: loop body
LE: loop exit
PB: predicated region body
PF: predicated region fallthrough
CT: control target
= control target key end

     0   :  { %v1288_v3 = vmov 0.0|0.0   ;;  %vm1289_vm0 = vmmov 0   ;;  %v1290_v6 = vmov 0.0   ;;  %s1510_s0 = inlined_call_operand.vmem [shape: f32[8,128], index: 0, kind: input, shape index: {}]   ;;  %s1511_s1 = inlined_call_operand.vmem [shape: f32[32,128], index: 1, kind: input, shape index: {}]   ;;  %s1512_s2 = inlined_call_operand.vmem [shape: f32[32,64], index: 2, kind: input, shape index: {}]   ;;  %s1513_s3 = inlined_call_operand.vmem [shape: f32[1,64], index: 3, kind: input, shape index: {}]   ;;  %s1514_s4 = inlined_call_operand.hbm [shape: f32[8,64], index: 4, kind: output, shape index: {}]  }
   0x1   :  { %v18_v0 = vld [vmem:[%s1511_s1] sm:$0xff]  ;;  %v19_v1 = vld [vmem:[%s1511_s1 + $0x8] sm:$0xff]  ;;  %v20_v2 = vld [vmem:[%s1511_s1 + $0x10] sm:$0xff]  ;;  %1136 = vmatprep.subr.bf16.mxu0 %v1288_v3  ;;  %1045 = vmatprep.mubr.msk.f32.mxu0 %vm1289_vm0, %v1290_v6 }
   0x2   :  { %v1329_v4 = vpack.c.bf16 %v19_v1, %v18_v0  ;;  %v21_v5 = vld [vmem:[%s1511_s1 + $0x18] sm:$0xff] }
   0x3   :  { %9 = vsyncpa [#allocation4], 0  ;;  %1142 = vmatprep.subr.bf16.mxu1 %v1288_v3  ;;  %1056 = vmatprep.mubr.msk.f32.mxu1 %vm1289_vm0, %v1290_v6  ;;  %v1340_v7 = vpack.c.bf16 %v21_v5, %v20_v2  ;;  %v27_v8 = vld [vmem:[%s1510_s0] sm:$0x1]  ;;  %v22_v14 = vlaneseq  ;;  %s1291_s24 = smov 64   ;;  %s1292_s25 = smov 32  }
   0x4   :  { %1138 = vmatpush3.bf16.msra.mxu0 %v1329_v4  ;;  %1144 = vmatpush3.bf16.msra.mxu1 %v1329_v4  ;;  %vm132_vm4 = vcmask 253952   ;;  %vm28_vm5 = vcmask 261120   ;;  %v134_v30 = vld [vmem:[%s1510_s0 + $0x1] sm:$0x1]  ;;  %v238_v49 = vld [vmem:[%s1510_s0 + $0x2] sm:$0x1] }
   0x5   :  { %1139 = vmatprep.subr.bf16.mxu0 %v1288_v3  ;;  %1145 = vmatprep.subr.bf16.mxu1 %v1288_v3  ;;  %v23_v16 = vand.u32 127, %v22_v14  ;;  %v864_v17 = vld [vmem:[%s1512_s2 + $0x8] sm:$0xff]  ;;  %vm947_vm6 = vcmask 523264  }
   0x7   :  { %vm24_vm1 = vcmp.ge.s32.totalorder %v23_v16, 64  ;;  %vm25_vm2 = vcmp.lt.s32.totalorder %v23_v16, 96 }
   0x8   :  { %1141 = vmatpush3.bf16.msra.mxu0 %v1340_v7  ;;  %1147 = vmatpush3.bf16.msra.mxu1 %v1340_v7  ;;  %vm1359_vm3 = vmand %vm24_vm1, %vm25_vm2 }
   0x9   :  { %1148 = vmatprep.subr.bf16.mxu0 %v1288_v3  ;;  %1154 = vmatprep.subr.bf16.mxu1 %v1288_v3 }
   0xb   :  { %1046 = vmatmul.mubr.f32.vlgmr.msra.gmra.mrb[0].mxu0 %v1290_v6 }
   0xc   :  { %1150 = vmatpush3.bf16.msra.mxu0 %v1329_v4  ;;  %1067 = vmatprep.mubr.msk.f32.mxu0 %vm1289_vm0, %v1290_v6 }
   0xd   :  { %1151 = vmatprep.subr.bf16.mxu0 %v1288_v3 }
  0x10   :  { %1153 = vmatpush3.bf16.msra.mxu0 %v1340_v7 }
  0x11   :  { %1160 = vmatprep.subr.bf16.mxu0 %v1288_v3 }
  0xde   :  { %v98_v9 = vpop.f32.mrb[0].mxu0 }
  0xdf   :  { %v102_v10 = vadd.f32 %v98_v9, %v27_v8  ;;  %v1047_v11 = vpop.f32.mrb[1].mxu0  ;;  %v342_v8 = vld [vmem:[%s1510_s0 + $0x3] sm:$0x1] }
  0xe1   :  { %v975_v12 = vmul.f32 -1.442695, %v102_v10 }
  0xe3   :  { %1196 = vpow2.f32 %v975_v12 }
  0xe4   :  { %1198 = vtanh.f32 %v102_v10 }
  0xed   :  { %v1197_v13 = vpop.eup %1196 }
  0xee   :  { %v106_v15 = vadd.f32 1.0, %v1197_v13  ;;  %v1199_v18 = vpop.eup %1198 }
  0xf0   :  { %1200 = vrcp.f32 %v106_v15 }
  0xfa   :  { %v1201_v19 = vpop.eup %1200 }
  0xfb   :  { %v110_v20 = vsel %vm1359_vm3, %v1199_v18, %v1201_v19 }
  0xfc   :  { %113 = vrot.lane.b32.xlu0 %v110_v20, %s1291_s24  ;;  %v111_v23 = vmul.f32 0.0, %v110_v20 }
 0x16e   :  { %v114_v21 = vpop.permute.xlu0 %113 }
 0x16f   :  { %v116_v22 = vmul.f32 %v114_v21, %v110_v20 }
 0x171   :  { %118 = vrot.lane.b32.xlu0 %v116_v22, %s1292_s25 }
 0x1e3   :  { %v119_v24 = vpop.permute.xlu0 %118 }
 0x1e4   :  { %v121_v25 = vadd.f32 %v119_v24, %v111_v23 }
 0x1e6   :  { %1202 = vtanh.f32 %v121_v25 }
 0x1f0   :  { %v1203_v26 = vpop.eup %1202 }
 0x1f1   :  { %124 = vrot.lane.b32.xlu1 %v1203_v26, %s1291_s24 }
 0x263   :  { %v125_v27 = vpop.permute.xlu1 %124 }
 0x264   :  { %v127_v28 = vmul.f32 %v125_v27, %v110_v20 }
 0x266   :  { %129 = vrot.lane.b32.xlu1 %v127_v28, %s1292_s25  ;;  %v446_v28 = vld [vmem:[%s1510_s0 + $0x4] sm:$0x1] }
 0x2d8   :  { %v130_v29 = vpop.permute.xlu1 %129 }
 0x2d9   :  { %133 = vst.msk [vmem:[#allocation2] sm:$0x1] %vm132_vm4, %v130_v29  ;;  %1057 = vmatmul.mubr.msk.f32.vlgmr.msra.gmra.mrb[0].mxu1 %vm28_vm5, %v130_v29 }
 0x2da   :  { %1156 = vmatpush3.bf16.msra.mxu1 %v1329_v4  ;;  %1078 = vmatprep.mubr.msk.f32.mxu1 %vm1289_vm0, %v1290_v6 }
 0x2db   :  { %1157 = vmatprep.subr.bf16.mxu1 %v1288_v3 }
 0x2de   :  { %1159 = vmatpush3.bf16.msra.mxu1 %v1340_v7 }
 0x2df   :  { %1166 = vmatprep.subr.bf16.mxu1 %v1288_v3 }
 0x3ac   :  { %v203_v31 = vpop.f32.mrb[0].mxu1 }
 0x3ad   :  { %v207_v32 = vadd.f32 %v203_v31, %v134_v30  ;;  %v1058_v33 = vpop.f32.mrb[1].mxu1 }
 0x3af   :  { %v977_v34 = vmul.f32 -1.442695, %v207_v32 }
 0x3b1   :  { %1204 = vpow2.f32 %v977_v34 }
 0x3b2   :  { %1206 = vtanh.f32 %v207_v32 }
 0x3bb   :  { %v1205_v35 = vpop.eup %1204 }
 0x3bc   :  { %v211_v36 = vadd.f32 1.0, %v1205_v35  ;;  %v1207_v37 = vpop.eup %1206 }
 0x3be   :  { %1208 = vrcp.f32 %v211_v36 }
 0x3c8   :  { %v1209_v38 = vpop.eup %1208 }
 0x3c9   :  { %v215_v39 = vsel %vm1359_vm3, %v1207_v37, %v1209_v38 }
 0x3ca   :  { %218 = vrot.lane.b32.xlu0 %v215_v39, %s1291_s24  ;;  %v216_v42 = vmul.f32 %v215_v39, %v121_v25 }
 0x43c   :  { %v219_v40 = vpop.permute.xlu0 %218 }
 0x43d   :  { %v221_v41 = vmul.f32 %v219_v40, %v215_v39 }
 0x43f   :  { %223 = vrot.lane.b32.xlu1 %v221_v41, %s1292_s25 }
 0x4b1   :  { %v224_v43 = vpop.permute.xlu1 %223 }
 0x4b2   :  { %v226_v44 = vadd.f32 %v224_v43, %v216_v42 }
 0x4b4   :  { %1210 = vtanh.f32 %v226_v44 }
 0x4be   :  { %v1211_v45 = vpop.eup %1210 }
 0x4bf   :  { %229 = vrot.lane.b32.xlu0 %v1211_v45, %s1291_s24 }
 0x531   :  { %v230_v46 = vpop.permute.xlu0 %229 }
 0x532   :  { %v232_v47 = vmul.f32 %v230_v46, %v215_v39 }
 0x534   :  { %234 = vrot.lane.b32.xlu1 %v232_v47, %s1292_s25  ;;  %v550_v47 = vld [vmem:[%s1510_s0 + $0x5] sm:$0x1] }
 0x5a6   :  { %v235_v48 = vpop.permute.xlu1 %234 }
 0x5a7   :  { %237 = vst.msk [vmem:[#allocation2 + $0x1] sm:$0x1] %vm132_vm4, %v235_v48  ;;  %1068 = vmatmul.mubr.msk.f32.vlgmr.msra.gmra.mrb[2].mxu0 %vm28_vm5, %v235_v48 }
 0x5a8   :  { %1162 = vmatpush3.bf16.msra.mxu0 %v1329_v4  ;;  %1089 = vmatprep.mubr.msk.f32.mxu0 %vm1289_vm0, %v1290_v6 }
 0x5a9   :  { %1163 = vmatprep.subr.bf16.mxu0 %v1288_v3 }
 0x5ac   :  { %1165 = vmatpush3.bf16.msra.mxu0 %v1340_v7 }
 0x5ad   :  { %1172 = vmatprep.subr.bf16.mxu0 %v1288_v3 }
 0x67a   :  { %v307_v50 = vpop.f32.mrb[2].mxu0 }
 0x67b   :  { %v311_v51 = vadd.f32 %v307_v50, %v238_v49  ;;  %v1069_v52 = vpop.f32.mrb[3].mxu0 }
 0x67d   :  { %v979_v53 = vmul.f32 -1.442695, %v311_v51 }
 0x67f   :  { %1212 = vpow2.f32 %v979_v53 }
 0x680   :  { %1214 = vtanh.f32 %v311_v51 }
 0x689   :  { %v1213_v54 = vpop.eup %1212 }
 0x68a   :  { %v315_v55 = vadd.f32 1.0, %v1213_v54  ;;  %v1215_v56 = vpop.eup %1214 }
 0x68c   :  { %1216 = vrcp.f32 %v315_v55 }
 0x696   :  { %v1217_v57 = vpop.eup %1216 }
 0x697   :  { %v319_v58 = vsel %vm1359_vm3, %v1215_v56, %v1217_v57 }
 0x698   :  { %322 = vrot.lane.b32.xlu0 %v319_v58, %s1291_s24  ;;  %v320_v61 = vmul.f32 %v319_v58, %v226_v44 }
 0x70a   :  { %v323_v59 = vpop.permute.xlu0 %322 }
 0x70b   :  { %v325_v60 = vmul.f32 %v323_v59, %v319_v58 }
 0x70d   :  { %327 = vrot.lane.b32.xlu1 %v325_v60, %s1292_s25 }
 0x77f   :  { %v328_v62 = vpop.permute.xlu1 %327 }
 0x780   :  { %v330_v63 = vadd.f32 %v328_v62, %v320_v61 }
 0x782   :  { %1218 = vtanh.f32 %v330_v63 }
 0x78c   :  { %v1219_v0 = vpop.eup %1218 }
 0x78d   :  { %333 = vrot.lane.b32.xlu0 %v1219_v0, %s1291_s24  ;;  %v654_v0 = vld [vmem:[%s1510_s0 + $0x6] sm:$0x1] }
 0x7ff   :  { %v334_v1 = vpop.permute.xlu0 %333 }
 0x800   :  { %v336_v2 = vmul.f32 %v334_v1, %v319_v58 }
 0x802   :  { %338 = vrot.lane.b32.xlu1 %v336_v2, %s1292_s25 }
 0x874   :  { %v339_v5 = vpop.permute.xlu1 %338 }
 0x875   :  { %341 = vst.msk [vmem:[#allocation2 + $0x2] sm:$0x1] %vm132_vm4, %v339_v5  ;;  %1079 = vmatmul.mubr.msk.f32.vlgmr.msra.gmra.mrb[2].mxu1 %vm28_vm5, %v339_v5 }
 0x876   :  { %1168 = vmatpush3.bf16.msra.mxu1 %v1329_v4  ;;  %1100 = vmatprep.mubr.msk.f32.mxu1 %vm1289_vm0, %v1290_v6 }
 0x877   :  { %1169 = vmatprep.subr.bf16.mxu1 %v1288_v3 }
 0x87a   :  { %1171 = vmatpush3.bf16.msra.mxu1 %v1340_v7 }
 0x87b   :  { %1178 = vmatprep.subr.bf16.mxu1 %v1288_v3 }
 0x948   :  { %v411_v9 = vpop.f32.mrb[2].mxu1 }
 0x949   :  { %v415_v10 = vadd.f32 %v411_v9, %v342_v8  ;;  %v1080_v11 = vpop.f32.mrb[3].mxu1 }
 0x94b   :  { %v981_v12 = vmul.f32 -1.442695, %v415_v10 }
 0x94d   :  { %1220 = vpow2.f32 %v981_v12 }
 0x94e   :  { %1222 = vtanh.f32 %v415_v10 }
 0x957   :  { %v1221_v13 = vpop.eup %1220 }
 0x958   :  { %v419_v14 = vadd.f32 1.0, %v1221_v13  ;;  %v1223_v15 = vpop.eup %1222 }
 0x95a   :  { %1224 = vrcp.f32 %v419_v14 }
 0x964   :  { %v1225_v16 = vpop.eup %1224 }
 0x965   :  { %v423_v18 = vsel %vm1359_vm3, %v1223_v15, %v1225_v16 }
 0x966   :  { %426 = vrot.lane.b32.xlu0 %v423_v18, %s1291_s24  ;;  %v424_v21 = vmul.f32 %v423_v18, %v330_v63 }
 0x9d8   :  { %v427_v19 = vpop.permute.xlu0 %426 }
 0x9d9   :  { %v429_v20 = vmul.f32 %v427_v19, %v423_v18 }
 0x9db   :  { %431 = vrot.lane.b32.xlu1 %v429_v20, %s1292_s25 }
 0xa4d   :  { %v432_v22 = vpop.permute.xlu1 %431 }
 0xa4e   :  { %v434_v23 = vadd.f32 %v432_v22, %v424_v21 }
 0xa50   :  { %1226 = vtanh.f32 %v434_v23 }
 0xa5a   :  { %v1227_v24 = vpop.eup %1226 }
 0xa5b   :  { %437 = vrot.lane.b32.xlu0 %v1227_v24, %s1291_s24 }
 0xacd   :  { %v438_v25 = vpop.permute.xlu0 %437 }
 0xace   :  { %v440_v26 = vmul.f32 %v438_v25, %v423_v18 }
 0xad0   :  { %442 = vrot.lane.b32.xlu1 %v440_v26, %s1292_s25 }
 0xb42   :  { %v443_v27 = vpop.permute.xlu1 %442 }
 0xb43   :  { %445 = vst.msk [vmem:[#allocation2 + $0x3] sm:$0x1] %vm132_vm4, %v443_v27  ;;  %1090 = vmatmul.mubr.msk.f32.vlgmr.msra.gmra.mrb[4].mxu0 %vm28_vm5, %v443_v27 }
 0xb44   :  { %1174 = vmatpush3.bf16.msra.mxu0 %v1329_v4  ;;  %1111 = vmatprep.mubr.msk.f32.mxu0 %vm1289_vm0, %v1290_v6 }
 0xb45   :  { %1175 = vmatprep.subr.bf16.mxu0 %v1288_v3 }
 0xb48   :  { %1177 = vmatpush3.bf16.msra.mxu0 %v1340_v7 }
 0xb49   :  { %1184 = vmatprep.subr.bf16.mxu0 %v1288_v3 }
 0xc16   :  { %v515_v29 = vpop.f32.mrb[4].mxu0 }
 0xc17   :  { %v519_v30 = vadd.f32 %v515_v29, %v446_v28  ;;  %v1091_v31 = vpop.f32.mrb[5].mxu0 }
 0xc19   :  { %v983_v32 = vmul.f32 -1.442695, %v519_v30 }
 0xc1b   :  { %1228 = vpow2.f32 %v983_v32 }
 0xc1c   :  { %1230 = vtanh.f32 %v519_v30 }
 0xc25   :  { %v1229_v33 = vpop.eup %1228 }
 0xc26   :  { %v523_v34 = vadd.f32 1.0, %v1229_v33  ;;  %v1231_v35 = vpop.eup %1230 }
 0xc28   :  { %1232 = vrcp.f32 %v523_v34 }
 0xc32   :  { %v1233_v36 = vpop.eup %1232 }
 0xc33   :  { %v527_v37 = vsel %vm1359_vm3, %v1231_v35, %v1233_v36 }
 0xc34   :  { %530 = vrot.lane.b32.xlu0 %v527_v37, %s1291_s24  ;;  %v528_v40 = vmul.f32 %v527_v37, %v434_v23  ;;  %v758_v23 = vld [vmem:[%s1510_s0 + $0x7] sm:$0x1] }
 0xca6   :  { %v531_v38 = vpop.permute.xlu0 %530 }
 0xca7   :  { %v533_v39 = vmul.f32 %v531_v38, %v527_v37 }
 0xca9   :  { %535 = vrot.lane.b32.xlu1 %v533_v39, %s1292_s25  ;;  %v863_v39 = vld [vmem:[%s1512_s2] sm:$0xff] }
 0xd1b   :  { %v536_v41 = vpop.permute.xlu1 %535 }
 0xd1c   :  { %v538_v42 = vadd.f32 %v536_v41, %v528_v40  ;;  %v1185_v40 = vpack.c.bf16 %v864_v17, %v863_v39  ;;  %v865_v41 = vld [vmem:[%s1512_s2 + $0x10] sm:$0xff] }
 0xd1e   :  { %1234 = vtanh.f32 %v538_v42 }
 0xd28   :  { %v1235_v43 = vpop.eup %1234 }
 0xd29   :  { %541 = vrot.lane.b32.xlu0 %v1235_v43, %s1291_s24 }
 0xd9b   :  { %v542_v44 = vpop.permute.xlu0 %541 }
 0xd9c   :  { %v544_v45 = vmul.f32 %v542_v44, %v527_v37 }
 0xd9e   :  { %546 = vrot.lane.b32.xlu1 %v544_v45, %s1292_s25 }
 0xe10   :  { %v547_v46 = vpop.permute.xlu1 %546 }
 0xe11   :  { %549 = vst.msk [vmem:[#allocation2 + $0x4] sm:$0x1] %vm132_vm4, %v547_v46  ;;  %1101 = vmatmul.mubr.msk.f32.vlgmr.msra.gmra.mrb[4].mxu1 %vm28_vm5, %v547_v46 }
 0xe12   :  { %1180 = vmatpush3.bf16.msra.mxu1 %v1329_v4  ;;  %1122 = vmatprep.mubr.msk.f32.mxu1 %vm1289_vm0, %v1290_v6 }
 0xe13   :  { %1181 = vmatprep.subr.bf16.mxu1 %v1288_v3 }
 0xe16   :  { %1183 = vmatpush3.bf16.msra.mxu1 %v1340_v7 }
 0xee4   :  { %v619_v48 = vpop.f32.mrb[4].mxu1 }
 0xee5   :  { %v623_v49 = vadd.f32 %v619_v48, %v550_v47  ;;  %v1102_v50 = vpop.f32.mrb[5].mxu1  ;;  %v990_v48 = vld [vmem:[%s1513_s3] ss:$0 sm:$0xff] }
 0xee7   :  { %v985_v51 = vmul.f32 -1.442695, %v623_v49 }
 0xee9   :  { %1236 = vpow2.f32 %v985_v51 }
 0xeea   :  { %1238 = vtanh.f32 %v623_v49 }
 0xef3   :  { %v1237_v52 = vpop.eup %1236 }
 0xef4   :  { %v627_v53 = vadd.f32 1.0, %v1237_v52  ;;  %v1239_v4 = vpop.eup %1238 }
 0xef6   :  { %1240 = vrcp.f32 %v627_v53 }
 0xf00   :  { %v1241_v54 = vpop.eup %1240 }
 0xf01   :  { %v631_v55 = vsel %vm1359_vm3, %v1239_v4, %v1241_v54 }
 0xf02   :  { %634 = vrot.lane.b32.xlu0 %v631_v55, %s1291_s24  ;;  %v632_v57 = vmul.f32 %v631_v55, %v538_v42  ;;  %v866_v42 = vld [vmem:[%s1512_s2 + $0x18] sm:$0xff]  ;;  %s1293_s2 = smov [#allocation3]  }
 0xf03   :  { %v1188_v43 = vpack.c.bf16 %v866_v42, %v865_v41  ;;  %s967_s3 = sshll.u32 %s1293_s2, 4  ;;  %s968_s3 = int_to_ptr.vmem [resolvable:$true] %s967_s3 }
 0xf04   :  { %s1264_s1 = scalar_lea.vmem %s968_s3, 128  ;;  %p1269_p1 = scmp.lt.s32.totalorder %s968_s3, %s968_s3 }
 0xf05   :  { %p1265_p0 = scmp.ne.s32.totalorder %s968_s3, %s1264_s1  ;;  %p1270_p2 = scmp.lt.s32.totalorder %s1264_s1, %s1264_s1 }
 0xf07   :  { %p1271_p3 = por %p1270_p2, %p1269_p1 }
 0xf09   :  { %p1272_p4 = pnand %p1271_p3, %p1265_p0 }
 0xf74   :  { %v635_v7 = vpop.permute.xlu0 %634 }
 0xf75   :  { %v637_v56 = vmul.f32 %v635_v7, %v631_v55 }
 0xf77   :  { %639 = vrot.lane.b32.xlu1 %v637_v56, %s1292_s25 }
 0xfe9   :  { %v640_v58 = vpop.permute.xlu1 %639 }
 0xfea   :  { %v642_v59 = vadd.f32 %v640_v58, %v632_v57 }
 0xfec   :  { %1242 = vtanh.f32 %v642_v59 }
 0xff6   :  { %v1243_v60 = vpop.eup %1242 }
 0xff7   :  { %645 = vrot.lane.b32.xlu0 %v1243_v60, %s1291_s24 }
0x1069   :  { %v646_v61 = vpop.permute.xlu0 %645 }
0x106a   :  { %v648_v62 = vmul.f32 %v646_v61, %v631_v55 }
0x106c   :  { %650 = vrot.lane.b32.xlu1 %v648_v62, %s1292_s25 }
0x10de   :  { %v651_v63 = vpop.permute.xlu1 %650 }
0x10df   :  { %653 = vst.msk [vmem:[#allocation2 + $0x5] sm:$0x1] %vm132_vm4, %v651_v63  ;;  %1112 = vmatmul.mubr.msk.f32.vlgmr.msra.gmra.mrb[6].mxu0 %vm28_vm5, %v651_v63 }
0x10e0   :  { %1133 = vmatprep.mubr.msk.f32.mxu0 %vm1289_vm0, %v1290_v6  ;;  %1186 = vmatpush3.bf16.msra.mxu0 %v1185_v40 }
0x10e1   :  { %1187 = vmatprep.subr.bf16.mxu0 %v1288_v3 }
0x10e4   :  { %1189 = vmatpush3.bf16.msra.mxu0 %v1188_v43 }
0x11b2   :  { %v723_v1 = vpop.f32.mrb[6].mxu0 }
0x11b3   :  { %v727_v2 = vadd.f32 %v723_v1, %v654_v0  ;;  %v1113_v5 = vpop.f32.mrb[7].mxu0 }
0x11b5   :  { %v987_v8 = vmul.f32 -1.442695, %v727_v2 }
0x11b7   :  { %1244 = vpow2.f32 %v987_v8 }
0x11b8   :  { %1246 = vtanh.f32 %v727_v2 }
0x11c1   :  { %v1245_v9 = vpop.eup %1244 }
0x11c2   :  { %v731_v10 = vadd.f32 1.0, %v1245_v9  ;;  %v1247_v11 = vpop.eup %1246 }
0x11c4   :  { %1248 = vrcp.f32 %v731_v10 }
0x11ce   :  { %v1249_v12 = vpop.eup %1248 }
0x11cf   :  { %v735_v13 = vsel %vm1359_vm3, %v1247_v11, %v1249_v12 }
0x11d0   :  { %738 = vrot.lane.b32.xlu0 %v735_v13, %s1291_s24  ;;  %v736_v15 = vmul.f32 %v735_v13, %v642_v59 }
0x1242   :  { %v739_v6 = vpop.permute.xlu0 %738 }
0x1243   :  { %v741_v14 = vmul.f32 %v739_v6, %v735_v13 }
0x1245   :  { %743 = vrot.lane.b32.xlu1 %v741_v14, %s1292_s25 }
0x12b7   :  { %v744_v16 = vpop.permute.xlu1 %743 }
0x12b8   :  { %v746_v18 = vadd.f32 %v744_v16, %v736_v15 }
0x12ba   :  { %1250 = vtanh.f32 %v746_v18 }
0x12c4   :  { %v1251_v19 = vpop.eup %1250 }
0x12c5   :  { %749 = vrot.lane.b32.xlu0 %v1251_v19, %s1291_s24 }
0x1337   :  { %v750_v20 = vpop.permute.xlu0 %749 }
0x1338   :  { %v752_v21 = vmul.f32 %v750_v20, %v735_v13 }
0x133a   :  { %754 = vrot.lane.b32.xlu1 %v752_v21, %s1292_s25 }
0x13ac   :  { %v755_v22 = vpop.permute.xlu1 %754 }
0x13ad   :  { %757 = vst.msk [vmem:[#allocation2 + $0x6] sm:$0x1] %vm132_vm4, %v755_v22  ;;  %1123 = vmatmul.mubr.msk.f32.vlgmr.msra.gmra.mrb[6].mxu1 %vm28_vm5, %v755_v22 }
0x1480   :  { %v827_v24 = vpop.f32.mrb[6].mxu1 }
0x1481   :  { %v831_v25 = vadd.f32 %v827_v24, %v758_v23  ;;  %v1124_v26 = vpop.f32.mrb[7].mxu1 }
0x1483   :  { %v989_v27 = vmul.f32 -1.442695, %v831_v25 }
0x1485   :  { %1252 = vpow2.f32 %v989_v27 }
0x1486   :  { %1254 = vtanh.f32 %v831_v25 }
0x148f   :  { %v1253_v28 = vpop.eup %1252 }
0x1490   :  { %v835_v29 = vadd.f32 1.0, %v1253_v28  ;;  %v1255_v30 = vpop.eup %1254 }
0x1492   :  { %1256 = vrcp.f32 %v835_v29 }
0x149c   :  { %v1257_v31 = vpop.eup %1256 }
0x149d   :  { %v839_v32 = vsel %vm1359_vm3, %v1255_v30, %v1257_v31 }
0x149e   :  { %842 = vrot.lane.b32.xlu0 %v839_v32, %s1291_s24  ;;  %v840_v35 = vmul.f32 %v839_v32, %v746_v18 }
0x1510   :  { %v843_v33 = vpop.permute.xlu0 %842 }
0x1511   :  { %v845_v34 = vmul.f32 %v843_v33, %v839_v32 }
0x1513   :  { %847 = vrot.lane.b32.xlu1 %v845_v34, %s1292_s25 }
0x1585   :  { %v848_v36 = vpop.permute.xlu1 %847 }
0x1586   :  { %v850_v37 = vadd.f32 %v848_v36, %v840_v35 }
0x1588   :  { %1258 = vtanh.f32 %v850_v37 }
0x1592   :  { %v1259_v38 = vpop.eup %1258 }
0x1593   :  { %853 = vrot.lane.b32.xlu0 %v1259_v38, %s1291_s24 }
0x1605   :  { %v854_v44 = vpop.permute.xlu0 %853 }
0x1606   :  { %v856_v45 = vmul.f32 %v854_v44, %v839_v32 }
0x1608   :  { %858 = vrot.lane.b32.xlu1 %v856_v45, %s1292_s25 }
0x167a   :  { %v859_v46 = vpop.permute.xlu1 %858 }
0x167b   :  { %861 = vst.msk [vmem:[#allocation2 + $0x7] sm:$0x1] %vm132_vm4, %v859_v46 }
0x1682   :  { %v862_v47 = vld [vmem:[#allocation2] sm:$0xff] }
0x1683   :  { %1134 = vmatmul.mubr.msk.f32.vlgmr.msra.gmra.mrb[8].mxu0 %vm28_vm5, %v862_v47 }
0x1756   :  { %v943_v49 = vpop.f32.mrb[8].mxu0 }
0x1757   :  { %v944_v50 = vadd.f32 %v990_v48, %v943_v49  ;;  %v1135_v51 = vpop.f32.mrb[9].mxu0 }
0x1759   :  { %v948_v3 = vsel %vm947_vm6, %v944_v50, -inf }
0x175a   :  { %949 = vmax.xlane.f32.xlu0 %v948_v3 }
0x17e7   :  { %v950_v52 = vpop.xlane.xlu0 %949 }
0x17e8   :  { %v951_v53 = vsub.f32 %v944_v50, %v950_v52 }
0x17ea   :  { %v952_v4 = vmul.f32 1.442695, %v951_v53 }
0x17ec   :  { %1260 = vpow2.f32 %v952_v4 }
0x17f6   :  { %v1261_v54 = vpop.eup %1260 }
0x17f7   :  { %v954_v55 = vsel %vm947_vm6, %v1261_v54, 0.0 }
0x17f8   :  { %955 = vadd.xlane.f32.xlu1 %v954_v55 }
0x1885   :  { %v956_v7 = vpop.xlane.xlu1 %955 }
0x1886   :  { %1262 = vlog2.f32 %v956_v7 }
0x1890   :  { %v1263_v56 = vpop.eup %1262 }
0x1891   :  { %v958_v57 = vmul.f32 0.6931472, %v1263_v56 }
0x1893   :  { %v959_v58 = vsub.f32 %v951_v53, %v958_v57 }
0x1895   :  { %960 = vst.msk [vmem:[#allocation3] sm:$0xff] %vm947_vm6, %v959_v58 }
0x1896   :  { %1275 = shalt.err (!%p1272_p4)
}
0x1897   :  { %s1276_s25 = scalar_lea.hbm %s1514_s4, 128 }
0x1898   :  { %p1277_p5 = scmp.ne.s32.totalorder %s1514_s4, %s1276_s25  ;;  %p1280_p6 = scmp.lt.u32.totalorder %s1276_s25, %s1514_s4 }
0x189a   :  { %p1282_p7 = pnand %p1280_p6, %p1277_p5 }
0x189c   :  { %1285 = shalt.err (!%p1282_p7)
}
0x189d   :  { %970 = dma.vmem_to_hbm [thread:$0]  %s968_s3, 128, %s1514_s4, [#allocation4]  }
0x189e   :  { %1286 = dma.done.wait [#allocation4], 128  }
0x189f   :  { %1287 = vsyncadd [#allocation4], 4294967168 }
0x18a0   :  { %974 = vsyncpa [#allocation4], 1 }

</bundles_post_ra>
